<compile_context>
chip_gen: v7x
topology: tpu7x:2x2x1
jax: 0.10.0
libtpu: 0.0.40
codegen_flags: <defaults>
</compile_context>

<pallas_src>
import jax
import jax.numpy as jnp
from jax.experimental import pallas as pl
from jax.experimental.pallas import tpu as pltpu


def _round_up(x, m):
    return (x + m - 1) // m * m


# ----------------------------------------------------------------------------
# Kernel 1 (prologue): h = tanh(x @ W1 + b1), stored in W2's dtype.
# ----------------------------------------------------------------------------
def _h_kernel(x_ref, w1_ref, b1_ref, h_ref):
    xw = jnp.dot(x_ref[...], w1_ref[...], preferred_element_type=jnp.float32)
    h_ref[...] = jnp.tanh(xw + b1_ref[...]).astype(h_ref.dtype)


# ----------------------------------------------------------------------------
# Kernel 2 (main stream): out = h @ W2 + b2, W2 streamed in lane-dense O tiles.
# ----------------------------------------------------------------------------
def _stream_kernel(h_ref, w2_ref, b2_ref, o_ref):
    o_ref[...] = (
        jnp.dot(h_ref[...], w2_ref[...], preferred_element_type=jnp.float32)
        + b2_ref[...]                                   # (1, tn) broadcast, f32
    ).astype(o_ref.dtype)


def prefix_mlp_pallas(x, w1, b1, w2, b2, *, tn_target=2048, out_dtype=None):
    """out = tanh(x @ w1 + b1) @ w2 + b2.

    x: (N, H); w1: (H, PH); b1: (1, PH) f32; w2: (PH, O); b2: (1, O) f32.
    Weights may be bf16 (halves the dominant W2 HBM stream); accumulation f32.
    """
    N, H = x.shape
    PH = w1.shape[1]
    O = w2.shape[1]
    out_dtype = jnp.dtype(out_dtype) if out_dtype is not None else jnp.dtype(x.dtype)

    # ---- generation-aware VMEM sizing ------------------------------------
    try:
        phys_vmem = int(pltpu.get_tpu_info().vmem_capacity_bytes)
    except Exception:  # pragma: no cover - conservative fallback (v7x size)
        phys_vmem = 64 << 20
    budget = min(phys_vmem - (8 << 20), 100 << 20)   # ~100 MiB v5e/v6e, ~56 MiB v7x

    h_dtype = w2.dtype
    h_item = jnp.dtype(h_dtype).itemsize
    w2_item = jnp.dtype(w2.dtype).itemsize
    out_item = out_dtype.itemsize

    # ---- row tile: keep ALL rows resident if VMEM allows (stream W2 once) --
    fixed_min = 2 * (PH * 128 * w2_item + 128 * 4)       # smallest streamed tile set
    per_row = 2 * PH * h_item + 2 * 128 * out_item
    tm_max = max(8, ((budget - fixed_min) // max(per_row, 1)) // 8 * 8)
    tm = min(_round_up(N, 8), tm_max)
    n_pad = _round_up(N, tm)

    # ---- O tile: large lane-dense multiple of 128 under the VMEM budget ----
    def est_main(tn, nbuf):
        return (2 * tm * PH * h_item                          # h row tile(s)
                + nbuf * (PH * tn * w2_item + tn * 4)         # W2 + b2 stream
                + 2 * tm * tn * out_item)                     # output tiles

    o_pad128 = _round_up(O, 128)
    tn = min(_round_up(tn_target, 128), o_pad128)
    while tn > 128 and est_main(tn, 3) > budget:
        tn -= 128
    nbuf = 3 if est_main(tn, 3) <= budget else 2
    o_pad = _round_up(O, tn)                                  # pad instead of tn=128
    n_o_tiles = o_pad // tn

    # ---- host-side plumbing (in a real deployment weights are pre-padded /
    #      pre-cast once; here it is per-call glue) --------------------------
    x_p = x.astype(w1.dtype)                                  # host cast, not in-kernel
    if n_pad != N:
        x_p = jnp.pad(x_p, ((0, n_pad - N), (0, 0)))
    w2_p, b2_p = w2, b2
    if o_pad != O:
        w2_p = jnp.pad(w2, ((0, 0), (0, o_pad - O)))
        b2_p = jnp.pad(b2, ((0, 0), (0, o_pad - O)))

    # ---- prologue: h = tanh(x @ W1 + b1) (row-tiled, W1 resident) ----------
    est_h = (H * PH * jnp.dtype(w1.dtype).itemsize + PH * 4
             + 2 * tm * H * jnp.dtype(x_p.dtype).itemsize
             + 2 * tm * PH * h_item)
    if est_h <= budget:
        h = pl.pallas_call(
            _h_kernel,
            out_shape=jax.ShapeDtypeStruct((n_pad, PH), h_dtype),
            grid_spec=pltpu.PrefetchScalarGridSpec(
                num_scalar_prefetch=0,
                grid=(n_pad // tm,),
                in_specs=[
                    pl.BlockSpec((tm, H), lambda i: (i, 0)),   # x row tile
                    pl.BlockSpec((H, PH), lambda i: (0, 0)),   # W1 resident
                    pl.BlockSpec((1, PH), lambda i: (0, 0)),   # b1 resident
                ],
                out_specs=pl.BlockSpec((tm, PH), lambda i: (i, 0)),
            ),
            compiler_params=pltpu.CompilerParams(
                dimension_semantics=("parallel",),
                vmem_limit_bytes=int(min(max(est_h + (4 << 20), 16 << 20),
                                         phys_vmem - (4 << 20))),
            ),
        )(x_p, w1, b1)
    else:
        # TODO(synk): tile the H / PH dims of the first matmul when W1 alone
        # exceeds the VMEM budget; plain-XLA fallback keeps semantics.
        h = jnp.tanh(x_p.astype(jnp.float32) @ w1.astype(jnp.float32)
                     + b1).astype(h_dtype)

    # ---- main streaming kernel: out = h @ W2 + b2 ---------------------------
    w2_spec = pl.BlockSpec((PH, tn), lambda i, j: (0, j))
    if nbuf == 3 and n_o_tiles >= 3:
        try:
            w2_spec = pl.BlockSpec((PH, tn), lambda i, j: (0, j),
                                   pipeline_mode=pl.Buffered(3))
        except TypeError:  # older BlockSpec without pipeline_mode
            pass

    out = pl.pallas_call(
        _stream_kernel,
        out_shape=jax.ShapeDtypeStruct((n_pad, o_pad), out_dtype),
        grid_spec=pltpu.PrefetchScalarGridSpec(
            num_scalar_prefetch=0,
            grid=(n_pad // tm, n_o_tiles),
            in_specs=[
                pl.BlockSpec((tm, PH), lambda i, j: (i, 0)),   # h (usually 1 row tile)
                w2_spec,                                        # W2 streamed once
                pl.BlockSpec((1, tn), lambda i, j: (0, j)),     # b2 streamed
            ],
            out_specs=pl.BlockSpec((tm, tn), lambda i, j: (i, j)),
        ),
        compiler_params=pltpu.CompilerParams(
            # Both axes are independent now that h is precomputed, so both may
            # be "parallel" (lets v7x's 2 TCs split the W2 / O stream).
            dimension_semantics=("parallel", "parallel"),
            vmem_limit_bytes=int(min(max(est_main(tn, nbuf) + (4 << 20), 16 << 20),
                                     phys_vmem - (4 << 20))),
        ),
    )(h, w2_p, b2_p)

    if n_pad != N or o_pad != O:
        out = out[:N, :O]
    return out


# ----------------------------------------------------------------------------
# PrefixEncoder: parameter setup + forward (embedding gather is glue in JAX,
# the matmul/tanh hot path runs in the Pallas kernels above).
# ----------------------------------------------------------------------------
class PrefixEncoder:
    """JAX/Pallas port of p-tuning-v2 PrefixEncoder.

    Input:  prefix ids (B, P) int32
    Output: (B, P, 2 * num_hidden_layers * hidden_size)
    """

    def __init__(self, *, pre_seq_len, hidden_size, prefix_hidden_size,
                 num_hidden_layers, prefix_projection=True,
                 param_dtype=jnp.float32, out_dtype=None, key=None):
        self.prefix_projection = prefix_projection
        self.hidden_size = hidden_size
        self.out_dim = num_hidden_layers * 2 * hidden_size
        self.out_dtype = out_dtype
        key = key if key is not None else jax.random.PRNGKey(0)
        k_emb, k_w1, k_b1, k_w2, k_b2 = jax.random.split(key, 5)

        if prefix_projection:
            # Embedding (pre_seq_len, H) -- init_type='normal' semantics.
            self.embedding = jax.random.normal(
                k_emb, (pre_seq_len, hidden_size), jnp.float32)
            # trans: Linear(H->PH), Tanh, Linear(PH->2*L*H).  Weights stored
            # pre-transposed (in, out).  param_dtype=jnp.bfloat16 recommended
            # at real sizes (halves the W2 HBM stream); accumulation stays f32.
            # TODO(synk): int8 (v5e/v6e) / fp8 (v7x) quantized W2 with
            # per-column scales would halve the dominant stream again.
            self.w1 = (jax.random.normal(k_w1, (hidden_size, prefix_hidden_size),
                                         jnp.float32) * 0.02).astype(param_dtype)
            self.b1 = jax.random.normal(k_b1, (1, prefix_hidden_size),
                                        jnp.float32) * 0.02
            self.w2 = (jax.random.normal(k_w2, (prefix_hidden_size, self.out_dim),
                                         jnp.float32) * 0.02).astype(param_dtype)
            self.b2 = jax.random.normal(k_b2, (1, self.out_dim),
                                        jnp.float32) * 0.02
        else:
            # Embedding (pre_seq_len, 2*L*H).
            self.embedding = jax.random.normal(
                k_emb, (pre_seq_len, self.out_dim), jnp.float32)

    def __call__(self, prefix):
        """prefix: (B, P) int32 -> (B, P, 2*L*H)."""
        B, P = prefix.shape
        if self.prefix_projection:
            # TODO(synk): the embedding gather could be fused into the prologue
            # kernel via PrefetchScalarGridSpec + pl.Element row indexing; kept
            # as plain-JAX glue (tiny table, negligible win).
            tokens = jnp.take(self.embedding, prefix.reshape(-1), axis=0)
            out = prefix_mlp_pallas(tokens, self.w1, self.b1, self.w2, self.b2,
                                    out_dtype=self.out_dtype)
            return out.reshape(B, P, self.out_dim)
        # TODO(synk): no-projection branch is a pure embedding gather with no
        # matmul/reduction hot path; kept as plain JAX.
        return jnp.take(self.embedding, prefix.reshape(-1), axis=0).reshape(
            B, P, self.out_dim)


# ----------------------------------------------------------------------------
# Demo / correctness check
# ----------------------------------------------------------------------------
if __name__ == "__main__":
    # Small config consistent with the module:
    #   pre_seq_len=16, hidden=32, prefix_hidden=64, layers=2 -> out = 2*2*32 = 128
    B, P = 2, 8
    pre_seq_len, hidden, prefix_hidden, layers = 16, 32, 64, 2

    root = jax.random.PRNGKey(0)
    k_params, k_ids = jax.random.split(root)

    enc = PrefixEncoder(
        pre_seq_len=pre_seq_len,
        hidden_size=hidden,
        prefix_hidden_size=prefix_hidden,
        num_hidden_layers=layers,
        prefix_projection=True,
        param_dtype=jnp.float32,   # use jnp.bfloat16 (+ bf16 out_dtype) at real sizes
        key=k_params,
    )

    prefix = jax.random.randint(k_ids, (B, P), 0, pre_seq_len, dtype=jnp.int32)

    out = enc(prefix)
    out = jax.block_until_ready(out)

    # Pure-JAX reference of the same forward pass.
    tok = jnp.take(enc.embedding, prefix.reshape(-1), axis=0)
    ref = (jnp.tanh(tok @ enc.w1 + enc.b1) @ enc.w2 + enc.b2).reshape(
        B, P, enc.out_dim)

    assert out.shape == (B, P, 2 * layers * hidden), out.shape
    assert jnp.allclose(out, ref, atol=1e-5, rtol=1e-5), "mismatch vs reference"

    print("KERNEL_OK")
</pallas_src>

<mosaic_0001>
module attributes {stable_mosaic.version = 11 : i64} {
  func.func @_h_kernel(%arg0: i32, %arg1: memref<16x32xf32, #tpu.memory_space<vmem>>, %arg2: memref<32x64xf32, #tpu.memory_space<vmem>>, %arg3: memref<1x64xf32, #tpu.memory_space<vmem>>, %arg4: memref<16x64xf32, #tpu.memory_space<vmem>>) attributes {dimension_semantics = [#tpu.dimension_semantics<parallel>], iteration_bounds = array<i64: 1>, scalar_prefetch = 0 : i64, scratch_operands = 0 : i64, tpu.core_type = #tpu.core_type<tc>, window_params = [{transform_indices = @transform_0, window_bounds = array<i64: 16, 32>}, {pipeline_mode = #tpu.pipeline_mode<synchronous>, transform_indices = @transform_1, window_bounds = array<i64: 32, 64>}, {pipeline_mode = #tpu.pipeline_mode<synchronous>, transform_indices = @transform_2, window_bounds = array<i64: 1, 64>}, {transform_indices = @transform_3, window_bounds = array<i64: 16, 64>}]} {
    %c0 = arith.constant 0 : index
    %c0_0 = arith.constant 0 : index
    %0 = vector.load %arg1[%c0, %c0_0] : memref<16x32xf32, #tpu.memory_space<vmem>>, vector<16x32xf32>
    %c0_1 = arith.constant 0 : index
    %c0_2 = arith.constant 0 : index
    %1 = vector.load %arg2[%c0_1, %c0_2] : memref<32x64xf32, #tpu.memory_space<vmem>>, vector<32x64xf32>
    %cst = arith.constant dense<0.000000e+00> : vector<16x64xf32>
    %2 = tpu.matmul %0, %1, %cst {dimension_numbers = #tpu.dot_dimension_numbers<[1], [0], [0], [1], [0, 0, 1, 1], [], []>} : vector<16x32xf32>, vector<32x64xf32>, vector<16x64xf32> -> vector<16x64xf32>
    %c0_3 = arith.constant 0 : index
    %c0_4 = arith.constant 0 : index
    %3 = vector.load %arg3[%c0_3, %c0_4] : memref<1x64xf32, #tpu.memory_space<vmem>>, vector<1x64xf32>
    %4 = vector.broadcast %3 : vector<1x64xf32> to vector<16x64xf32>
    %5 = arith.addf %2, %4 : vector<16x64xf32>
    %6 = math.tanh %5 : vector<16x64xf32>
    %c0_5 = arith.constant 0 : index
    %c0_6 = arith.constant 0 : index
    %7 = vector.load %arg4[%c0_5, %c0_6] : memref<16x64xf32, #tpu.memory_space<vmem>>, vector<16x64xf32>
    tpu.vector_store %arg4[%c0_5, %c0_6], %6 {strides = array<i32>} : memref<16x64xf32, #tpu.memory_space<vmem>>, vector<16x64xf32>,
    return
  }
  func.func @transform_0(%arg0: i32) -> (i32, i32) {
    %c0_i32 = arith.constant 0 : i32
    %c0_i32_0 = arith.constant 0 : i32
    return %arg0, %c0_i32 : i32, i32
  }
  func.func @transform_1(%arg0: i32) -> (i32, i32) {
    %c0_i32 = arith.constant 0 : i32
    %c0_i32_0 = arith.constant 0 : i32
    %c0_i32_1 = arith.constant 0 : i32
    return %c0_i32, %c0_i32_0 : i32, i32
  }
  func.func @transform_2(%arg0: i32) -> (i32, i32) {
    %c0_i32 = arith.constant 0 : i32
    %c0_i32_0 = arith.constant 0 : i32
    %c0_i32_1 = arith.constant 0 : i32
    return %c0_i32, %c0_i32_0 : i32, i32
  }
  func.func @transform_3(%arg0: i32) -> (i32, i32) {
    %c0_i32 = arith.constant 0 : i32
    %c0_i32_0 = arith.constant 0 : i32
    return %arg0, %c0_i32 : i32, i32
  }
}

</mosaic_0001>

<bundles_post_ra>
// kernel: tpu_custom_call.1
= control target key start
LH: loop header
LB: loop body
LE: loop exit
PB: predicated region body
PF: predicated region fallthrough
CT: control target
= control target key end

     0   :  { %8 = vsyncpa [#allocation3], 0  ;;  %s343_s0 = inlined_call_operand.hbm [shape: f32[16,32], index: 0, kind: input, shape index: {}]   ;;  %s344_s1 = inlined_call_operand.hbm [shape: f32[32,64], index: 1, kind: input, shape index: {}]   ;;  %s345_s2 = inlined_call_operand.vmem [shape: f32[1,64], index: 2, kind: input, shape index: {}]   ;;  %s346_s3 = inlined_call_operand.hbm [shape: f32[16,64], index: 3, kind: output, shape index: {}]  }
   0x1   :  { %9 = vsyncpa [#allocation6], 0 }
   0x2   :  { %10 = vsyncpa [#allocation4], 0  ;;  %s270_s12 = smov [#allocation2]   ;;  %s198_s16 = scalar_lea.hbm %s343_s0, 256 }
   0x3   :  { %s16_s13 = sshll.u32 %s270_s12, 4  ;;  %p199_p0 = scmp.ne.s32.totalorder %s343_s0, %s198_s16  ;;  %s17_s13 = int_to_ptr.vmem [resolvable:$true] %s16_s13 }
   0x4   :  { %p202_p1 = scmp.lt.u32.totalorder %s198_s16, %s343_s0 }
   0x6   :  { %p204_p2 = pnand %p202_p1, %p199_p0 }
   0x8   :  { %207 = shalt.err (!%p204_p2)
}
   0x9   :  { %s208_s21 = scalar_lea.vmem %s17_s13, 256  ;;  %p213_p4 = scmp.lt.s32.totalorder %s17_s13, %s17_s13 }
   0xa   :  { %p209_p3 = scmp.ne.s32.totalorder %s17_s13, %s208_s21  ;;  %p214_p5 = scmp.lt.s32.totalorder %s208_s21, %s208_s21 }
   0xc   :  { %p215_p6 = por %p214_p5, %p213_p4 }
   0xe   :  { %p216_p7 = pnand %p215_p6, %p209_p3 }
  0x10   :  { %219 = shalt.err (!%p216_p7)
}
  0x11   :  { %s271_s22 = smov 128   ;;  %s272_s23 = smov 8  }
  0x12   :  { %22 = dma.hbm_to_vmem [thread:$0]  %s343_s0, 256, %s17_s13, [#allocation3], %s271_s22, %s271_s22, %s272_s23  }
  0x13   :  { %s273_s26 = smov [#allocation5]   ;;  %s220_s30 = scalar_lea.hbm %s344_s1, 512 }
  0x14   :  { %s28_s27 = sshll.u32 %s273_s26, 4  ;;  %p221_p8 = scmp.ne.s32.totalorder %s344_s1, %s220_s30  ;;  %s29_s27 = int_to_ptr.vmem [resolvable:$true] %s28_s27 }
  0x15   :  { %p224_p9 = scmp.lt.u32.totalorder %s220_s30, %s344_s1 }
  0x17   :  { %p226_p10 = pnand %p224_p9, %p221_p8 }
  0x19   :  { %229 = shalt.err (!%p226_p10)
}
  0x1a   :  { %s230_s8 = scalar_lea.vmem %s29_s27, 512  ;;  %p235_p12 = scmp.lt.s32.totalorder %s29_s27, %s29_s27 }
  0x1b   :  { %p231_p11 = scmp.ne.s32.totalorder %s29_s27, %s230_s8  ;;  %p236_p13 = scmp.lt.s32.totalorder %s230_s8, %s230_s8 }
  0x1d   :  { %p237_p0 = por %p236_p13, %p235_p12 }
  0x1f   :  { %p238_p1 = pnand %p237_p0, %p231_p11 }
  0x21   :  { %241 = shalt.err (!%p238_p1)
}
  0x22   :  { %34 = dma.hbm_to_vmem [thread:$0]  %s344_s1, 512, %s29_s27, [#allocation6], %s271_s22, %s271_s22, %s272_s23  }
  0x23   :  { %264 = dma.done.wait [#allocation3], 256  }
  0x24   :  { %265 = vsyncadd [#allocation3], 4294967040 }
  0x25   :  { %266 = dma.done.wait [#allocation6], 512  }
  0x26   :  { %267 = vsyncadd [#allocation6], 4294966784  ;;  %vm56_vm0 = vcmask 261120   ;;  %v45_v0 = vld [vmem:[#allocation5] sm:$0xff]  ;;  %v46_v1 = vld [vmem:[#allocation5 + $0x8] sm:$0xff]  ;;  %s274_s11 = smov [#allocation7]  }
  0x27   :  { %v47_v2 = vld [vmem:[#allocation5 + $0x10] sm:$0xff]  ;;  %v181_v3 = vpack.c.bf16 %v46_v1, %v45_v0  ;;  %v48_v4 = vld [vmem:[#allocation5 + $0x18] sm:$0xff]  ;;  %s148_s12 = sshll.u32 %s274_s11, 4  ;;  %vm140_vm1 = vcmask 523264   ;;  %s149_s12 = int_to_ptr.vmem [resolvable:$true] %s148_s12 }
  0x28   :  { %v43_v5 = vld [vmem:[#allocation2] sm:$0xff]  ;;  %v185_v6 = vpack.c.bf16 %v48_v4, %v47_v2  ;;  %v44_v7 = vld [vmem:[#allocation2 + $0x8] sm:$0xff]  ;;  %s242_s13 = scalar_lea.vmem %s149_s12, 256  ;;  %p247_p3 = scmp.lt.s32.totalorder %s149_s12, %s149_s12 }
  0x29   :  { %178 = vmatprep.mubr.msk.f32.mxu0 %vm56_vm0, %v43_v5  ;;  %182 = vmatprep.subr.bf16.mxu0 %v181_v3  ;;  %v161_v8 = vld [vmem:[%s345_s2] ss:$0 sm:$0xff]  ;;  %p243_p2 = scmp.ne.s32.totalorder %s149_s12, %s242_s13  ;;  %p248_p4 = scmp.lt.s32.totalorder %s242_s13, %s242_s13 }
  0x2a   :  { %184 = vmatpush3.bf16.msra.mxu0 %v181_v3 }
  0x2b   :  { %186 = vmatprep.subr.bf16.mxu0 %v185_v6  ;;  %p249_p5 = por %p248_p4, %p247_p3 }
  0x2d   :  { %p250_p6 = pnand %p249_p5, %p243_p2 }
  0x2e   :  { %188 = vmatpush3.bf16.msra.mxu0 %v185_v6 }
  0x31   :  { %179 = vmatmul.mubr.msk.f32.vlgmr.msra.gmra.mrb[0].mxu0 %vm56_vm0, %v44_v7 }
 0x104   :  { %v180_v9 = vpop.f32.mrb[0].mxu0 }
 0x105   :  { %v135_v10 = vadd.f32 %v180_v9, %v161_v8  ;;  %v129_v11 = vpop.f32.mrb[1].mxu0 }
 0x106   :  { %v130_v12 = vadd.f32 %v161_v8, %v129_v11 }
 0x107   :  { %194 = vtanh.f32 %v135_v10 }
 0x108   :  { %196 = vtanh.f32 %v130_v12 }
 0x111   :  { %v195_v13 = vpop.eup %194 }
 0x112   :  { %v197_v14 = vpop.eup %196  ;;  %142 = vst.msk [vmem:[#allocation7 + $0x8] sm:$0xff] %vm140_vm1, %v195_v13 }
 0x113   :  { %141 = vst.msk [vmem:[#allocation7] sm:$0xff] %vm140_vm1, %v197_v14 }
 0x114   :  { %253 = shalt.err (!%p250_p6)
}
 0x115   :  { %s254_s15 = scalar_lea.hbm %s346_s3, 256 }
 0x116   :  { %p255_p7 = scmp.ne.s32.totalorder %s346_s3, %s254_s15  ;;  %p258_p8 = scmp.lt.u32.totalorder %s254_s15, %s346_s3 }
 0x118   :  { %p260_p9 = pnand %p258_p8, %p255_p7 }
 0x11a   :  { %263 = shalt.err (!%p260_p9)
}
 0x11b   :  { %154 = dma.vmem_to_hbm [thread:$0]  %s149_s12, 256, %s346_s3, [#allocation4], %s271_s22, %s271_s22, %s272_s23  }
 0x11c   :  { %268 = dma.done.wait [#allocation4], 256  }
 0x11d   :  { %269 = vsyncadd [#allocation4], 4294967040 }
 0x11e   :  { %158 = vsyncpa [#allocation3], 1 }
 0x11f   :  { %159 = vsyncpa [#allocation6], 1 }
 0x120   :  { %160 = vsyncpa [#allocation4], 1 }

</bundles_post_ra>
